<compile_context>
chip_gen: v7x
topology: tpu7x:2x2x1
jax: 0.10.0
libtpu: 0.0.40
codegen_flags: <defaults>
</compile_context>

<pallas_src>
import jax
import jax.numpy as jnp
from jax.experimental import pallas as pl
from jax.experimental.pallas import tpu as pltpu


# --------------------------- generation tuning -------------------------------

def _device_kind():
    try:
        return jax.devices()[0].device_kind.lower()
    except Exception:
        return ""


_KIND = _device_kind()
# v5e and older have no bf16 VPU/EUP -> keep elementwise math in f32 there.
_PRE_V6 = any(t in _KIND for t in ("v2", "v3", "v4", "v5"))
# v5e/v6e have 128 MiB physical VMEM; v7x only 64 MiB (unknown -> conservative).
_BIG_VMEM = any(t in _KIND for t in ("v5", "v6"))
_COMPUTE_DTYPE = jnp.float32 if _PRE_V6 else jnp.bfloat16
_VMEM_LIMIT_BYTES = (64 if _BIG_VMEM else 32) * 1024 * 1024
_MAX_PIXELS = 4096 if _BIG_VMEM else 2048
_HIDDEN_CHUNK = 256


def _silu(h):
    """SiLU with a single-EUP-op sigmoid: sigmoid(x) == 0.5*tanh(0.5*x) + 0.5.

    Runs in bf16 on v6e/v7x (bf16 VPU/EUP), f32 on older chips.  Used by both
    the kernel and the pure-jnp reference so numerics match.
    """
    hc = h.astype(_COMPUTE_DTYPE)
    return hc * (jnp.tanh(hc * 0.5) * 0.5 + 0.5)


def _pick_pixels(hw, n, cap):
    """Largest 128-multiple divisor of hw that is <= cap; prefer an even total
    grid-step count so both v7x TensorCores get work."""
    cap = max(128, min(cap, hw))
    best = None
    for p in range(cap, 127, -1):
        if hw % p or p % 128:
            continue
        if best is None:
            best = p
        if (n * (hw // p)) % 2 == 0:
            if 2 * p >= best:
                return p
            break
    return best


# ------------------------------ fused kernel ---------------------------------

def _calculator_kernel(x_ref, w1_ref, w2_ref, b2_ref,
                       ow1_ref, ob1_ref, ow2_ref, ob2_ref, o_ref):
    """Fused pixel-MLP + operator MLP for one (image, pixel-tile) grid cell.

    x_ref  : (C+1, P)      f32   pixel tile (channels on sublanes, pixels on
                                 lanes); last channel row is constant 1 (bias).
    w1_ref : (NC, KC, C+1) f32   conv1 weight with bias column, chunked on Hid.
    w2_ref : (NC, T, KC)   bf16  conv2 weight, chunked on Hid.
    b2_ref : (T, 1)        f32   conv2 bias.
    ow1_ref: (128, 128)    bf16  kron(I_{128//T}, op_w1).
    ob1_ref: (1, 128)      f32   tile(op_b1, 128//T).
    ow2_ref: (128, 128)    bf16  kron(I_{128//T}, op_w2).
    ob2_ref: (1, 128)      f32   tile(op_b2, 128//T).
    o_ref  : (T, P)        f32   final operator output, NCHW order (lane-dense).
    """
    P = x_ref.shape[1]
    T = o_ref.shape[0]
    n_chunks = w1_ref.shape[0]

    xa = x_ref[...]                                          # (C+1, P) f32

    # ---- stage 1: Conv1x1(C,Hid) -> SiLU -> Conv1x1(Hid,T), chunked over Hid
    # so only a (KC, P) slab of the hidden activation is live at a time.
    def chunk_body(k, acc):
        w1c = w1_ref[k]                                      # (KC, C+1) f32
        w2c = w2_ref[k]                                      # (T, KC)   bf16
        hk = jnp.dot(w1c, xa, preferred_element_type=jnp.float32)   # (KC, P)
        s = _silu(hk)                                        # bf16 on v6e/v7x
        return acc + jnp.dot(w2c, s.astype(jnp.bfloat16),
                             preferred_element_type=jnp.float32)

    acc0 = jnp.zeros((T, P), jnp.float32) + b2_ref[...]      # bias-initialised
    acc = jax.lax.fori_loop(0, n_chunks, chunk_body, acc0)   # (T, P) f32

    # ---- stage 2 (fused): Linear(T,T) -> SiLU -> Linear(T,T) applied to every
    # group of T consecutive lanes (== every row of the PyTorch x.view(-1, T)),
    # via block-diagonal kron weights on 128-lane, lane-aligned chunks.
    y = acc.astype(jnp.bfloat16)
    ow1 = ow1_ref[...]
    ob1 = ob1_ref[...]
    ow2 = ow2_ref[...]
    ob2 = ob2_ref[...]
    for j in range(P // 128):                                # static, lane-aligned
        lo, hi = j * 128, (j + 1) * 128
        h2 = jnp.dot(y[:, lo:hi], ow1,
                     preferred_element_type=jnp.float32) + ob1
        s2 = _silu(h2)
        z = jnp.dot(s2.astype(jnp.bfloat16), ow2,
                    preferred_element_type=jnp.float32) + ob2
        o_ref[:, lo:hi] = z


# ------------------------------ wrappers -------------------------------------

def pack_calculator_params(params, *, hidden_chunk=_HIDDEN_CHUNK):
    """One-time packing of raw params into kernel layouts (hoisted out of the
    jitted forward so kron/tile/concat never rerun per step)."""
    w1 = jnp.asarray(params["conv_w1t"], jnp.float32)        # (Hid, C)
    b1 = jnp.asarray(params["conv_b1"], jnp.float32)         # (Hid,)
    w2 = jnp.asarray(params["conv_w2t"], jnp.float32)        # (T, Hid)
    b2 = jnp.asarray(params["conv_b2"], jnp.float32)         # (T,)
    hid, c = w1.shape
    t = w2.shape[0]
    if 128 % t != 0:
        # TODO(synk): general T (not a divisor of 128) needs a different
        # stage-2 packing; only the kron-128 fused path is implemented.
        raise NotImplementedError("num_temperature_bins must divide 128")
    kc = hidden_chunk if hid % hidden_chunk == 0 else hid
    nc = hid // kc

    w1aug = jnp.concatenate([w1, b1[:, None]], axis=1)       # (Hid, C+1)
    w1c = w1aug.reshape(nc, kc, c + 1)
    w2c = w2.astype(jnp.bfloat16).reshape(t, nc, kc).transpose(1, 0, 2)

    pack = 128 // t
    eye = jnp.eye(pack, dtype=jnp.float32)
    ow1 = jnp.kron(eye, jnp.asarray(params["op_w1"], jnp.float32)).astype(jnp.bfloat16)
    ow2 = jnp.kron(eye, jnp.asarray(params["op_w2"], jnp.float32)).astype(jnp.bfloat16)
    ob1 = jnp.tile(jnp.asarray(params["op_b1"], jnp.float32), pack).reshape(1, 128)
    ob2 = jnp.tile(jnp.asarray(params["op_b2"], jnp.float32), pack).reshape(1, 128)

    return {"w1c": w1c, "w2c": w2c, "b2": b2.reshape(t, 1),
            "ow1": ow1, "ob1": ob1, "ow2": ow2, "ob2": ob2}


@jax.jit
def calculator_forward(x, response_function, packed):
    """Forward of Calculator (model_type='pixel').

    NOTE: the PyTorch forward has a bare `return` and ignores
    response_function; we ignore response_function and return the operator
    output so the kernel is testable.
    """
    del response_function
    N, C, H, W = x.shape
    HW = H * W
    nc, kc, c1 = packed["w1c"].shape
    T = packed["b2"].shape[0]
    if c1 != C + 1:
        raise ValueError("packed params do not match input channel count")
    if HW % 128 != 0:
        # TODO(synk): H*W not a multiple of 128 would need padded/masked tiles.
        raise NotImplementedError("H*W must be a multiple of 128")

    P = _pick_pixels(HW, N, _MAX_PIXELS)

    # Fold conv1 bias into the first matmul: append a constant ones channel.
    x3 = x.reshape(N, C, HW)
    x_aug = jnp.concatenate([x3, jnp.ones_like(x3[:, :1, :])], axis=1)

    y = pl.pallas_call(
        _calculator_kernel,
        out_shape=jax.ShapeDtypeStruct((N, T, HW), jnp.float32),
        grid_spec=pltpu.PrefetchScalarGridSpec(
            num_scalar_prefetch=0,
            grid=(N, HW // P),
            in_specs=[
                pl.BlockSpec((None, C + 1, P), lambda n, p: (n, 0, p)),
                pl.BlockSpec((nc, kc, C + 1), lambda n, p: (0, 0, 0)),
                pl.BlockSpec((nc, T, kc), lambda n, p: (0, 0, 0)),
                pl.BlockSpec((T, 1), lambda n, p: (0, 0)),
                pl.BlockSpec((128, 128), lambda n, p: (0, 0)),
                pl.BlockSpec((1, 128), lambda n, p: (0, 0)),
                pl.BlockSpec((128, 128), lambda n, p: (0, 0)),
                pl.BlockSpec((1, 128), lambda n, p: (0, 0)),
            ],
            out_specs=pl.BlockSpec((None, T, P), lambda n, p: (n, 0, p)),
        ),
        compiler_params=pltpu.CompilerParams(
            dimension_semantics=("parallel", "parallel"),
            vmem_limit_bytes=_VMEM_LIMIT_BYTES),
    )(x_aug, packed["w1c"], packed["w2c"], packed["b2"],
      packed["ow1"], packed["ob1"], packed["ow2"], packed["ob2"])

    # PyTorch `x.view(-1, T)`: rows are T consecutive elements of the flat
    # contiguous NCHW buffer -> pure (free) reshape of the (N, T, HW) result.
    return y.reshape(-1, T)


# ------------------------------ init / reference -----------------------------

def init_calculator_params(key, num_euv_channels, num_temperature_bins,
                           hidden=1024, dtype=jnp.float32):
    """Synthetic params with PyTorch-style uniform(+-1/sqrt(fan_in)) init.

    conv_w1t: (Hid, C), conv_w2t: (T, Hid)  (1x1 conv weights, squeezed).
    op_w1/op_w2: (T, T) stored (in, out) so forward is `rows @ W + b`.
    """
    C, T = num_euv_channels, num_temperature_bins
    ks = jax.random.split(key, 8)

    def u(k, shape, fan_in):
        bound = 1.0 / jnp.sqrt(fan_in)
        return jax.random.uniform(k, shape, dtype, -bound, bound)

    return {
        "conv_w1t": u(ks[0], (hidden, C), C),
        "conv_b1":  u(ks[1], (hidden,), C),
        "conv_w2t": u(ks[2], (T, hidden), hidden),
        "conv_b2":  u(ks[3], (T,), hidden),
        "op_w1":    u(ks[4], (T, T), T),
        "op_b1":    u(ks[5], (T,), T),
        "op_w2":    u(ks[6], (T, T), T),
        "op_b2":    u(ks[7], (T,), T),
    }


def _reference_forward(x, params):
    """Pure-jnp reference with the same dtype policy as the kernel."""
    N, C, H, W = x.shape
    T = params["conv_w2t"].shape[0]
    xp = jnp.transpose(x, (0, 2, 3, 1)).reshape(-1, C)
    h = xp @ params["conv_w1t"].T + params["conv_b1"][None, :]
    s = _silu(h).astype(jnp.bfloat16)
    y = jnp.dot(s, params["conv_w2t"].astype(jnp.bfloat16).T,
                preferred_element_type=jnp.float32) + params["conv_b2"][None, :]
    # NHWC pixel rows -> flat NCHW buffer -> rows of T consecutive elements.
    y_rows = jnp.transpose(y.reshape(N, H * W, T), (0, 2, 1)).reshape(-1, T)
    h2 = jnp.dot(y_rows.astype(jnp.bfloat16),
                 params["op_w1"].astype(jnp.bfloat16),
                 preferred_element_type=jnp.float32) + params["op_b1"][None, :]
    s2 = _silu(h2).astype(jnp.bfloat16)
    z = jnp.dot(s2, params["op_w2"].astype(jnp.bfloat16),
                preferred_element_type=jnp.float32) + params["op_b2"][None, :]
    return z


if __name__ == "__main__":
    num_euv_channels = 4
    num_temperature_bins = 32
    N, H, W = 2, 16, 16

    key = jax.random.PRNGKey(0)
    k_x, k_rf, k_p = jax.random.split(key, 3)

    x = jax.random.normal(k_x, (N, num_euv_channels, H, W), jnp.float32)
    # response_function is unused by forward(); shape chosen as (C, T).
    response_function = jax.random.normal(
        k_rf, (num_euv_channels, num_temperature_bins), jnp.float32)
    params = init_calculator_params(k_p, num_euv_channels, num_temperature_bins)
    packed = pack_calculator_params(params)

    out = calculator_forward(x, response_function, packed)
    out = jax.block_until_ready(out)

    ref = _reference_forward(x, params)
    assert out.shape == (N * H * W, num_temperature_bins), out.shape
    max_diff = float(jnp.max(jnp.abs(out - ref)))
    assert jnp.allclose(out, ref, atol=1e-2, rtol=2e-2), (
        "mismatch vs reference: max abs diff = %f" % max_diff)

    print("KERNEL_OK")
</pallas_src>

<mosaic_0001>
module attributes {stable_mosaic.version = 11 : i64} {
  func.func @_calculator_kernel(%arg0: i32, %arg1: i32, %arg2: memref<1x5x256xf32, #tpu.memory_space<vmem>>, %arg3: memref<4x256x5xf32, #tpu.memory_space<vmem>>, %arg4: memref<4x32x256xbf16, #tpu.memory_space<vmem>>, %arg5: memref<32x1xf32, #tpu.memory_space<vmem>>, %arg6: memref<128x128xbf16, #tpu.memory_space<vmem>>, %arg7: memref<1x128xf32, #tpu.memory_space<vmem>>, %arg8: memref<128x128xbf16, #tpu.memory_space<vmem>>, %arg9: memref<1x128xf32, #tpu.memory_space<vmem>>, %arg10: memref<1x32x256xf32, #tpu.memory_space<vmem>>) attributes {dimension_semantics = [#tpu.dimension_semantics<parallel>, #tpu.dimension_semantics<parallel>], iteration_bounds = array<i64: 2, 1>, scalar_prefetch = 0 : i64, scratch_operands = 0 : i64, tpu.core_type = #tpu.core_type<tc>, window_params = [{transform_indices = @transform_0, window_bounds = array<i64: 1, 5, 256>}, {pipeline_mode = #tpu.pipeline_mode<synchronous>, transform_indices = @transform_1, window_bounds = array<i64: 4, 256, 5>}, {pipeline_mode = #tpu.pipeline_mode<synchronous>, transform_indices = @transform_2, window_bounds = array<i64: 4, 32, 256>}, {pipeline_mode = #tpu.pipeline_mode<synchronous>, transform_indices = @transform_3, window_bounds = array<i64: 32, 1>}, {pipeline_mode = #tpu.pipeline_mode<synchronous>, transform_indices = @transform_4, window_bounds = array<i64: 128, 128>}, {pipeline_mode = #tpu.pipeline_mode<synchronous>, transform_indices = @transform_5, window_bounds = array<i64: 1, 128>}, {pipeline_mode = #tpu.pipeline_mode<synchronous>, transform_indices = @transform_6, window_bounds = array<i64: 128, 128>}, {pipeline_mode = #tpu.pipeline_mode<synchronous>, transform_indices = @transform_7, window_bounds = array<i64: 1, 128>}, {transform_indices = @transform_8, window_bounds = array<i64: 1, 32, 256>}]} {
    %c0 = arith.constant 0 : index
    %c0_0 = arith.constant 0 : index
    %c0_1 = arith.constant 0 : index
    %0 = vector.load %arg2[%c0, %c0_0, %c0_1] : memref<1x5x256xf32, #tpu.memory_space<vmem>>, vector<1x5x256xf32>
    %1 = vector.shape_cast %0 : vector<1x5x256xf32> to vector<5x256xf32>
    %cst = arith.constant 0.000000e+00 : f32
    %2 = vector.broadcast %cst : f32 to vector<32x256xf32>
    %c0_2 = arith.constant 0 : index
    %c0_3 = arith.constant 0 : index
    %3 = vector.load %arg5[%c0_2, %c0_3] : memref<32x1xf32, #tpu.memory_space<vmem>>, vector<32x1xf32>
    %4 = vector.broadcast %3 : vector<32x1xf32> to vector<32x256xf32>
    %5 = arith.addf %2, %4 : vector<32x256xf32>
    %c0_i32 = arith.constant 0 : i32
    %c4_i32 = arith.constant 4 : i32
    %6 = arith.addi %c0_i32, %c4_i32 : i32
    %c1_i32 = arith.constant 1 : i32
    %7 = scf.for %arg11 = %c0_i32 to %6 step %c1_i32 iter_args(%arg12 = %5) -> (vector<32x256xf32>)  : i32 {
      %51 = arith.index_cast %arg11 : i32 to index
      %c0_28 = arith.constant 0 : index
      %c0_29 = arith.constant 0 : index
      %52 = vector.load %arg3[%51, %c0_28, %c0_29] : memref<4x256x5xf32, #tpu.memory_space<vmem>>, vector<1x256x5xf32>
      %53 = vector.shape_cast %52 : vector<1x256x5xf32> to vector<256x5xf32>
      %54 = arith.index_cast %arg11 : i32 to index
      %c0_30 = arith.constant 0 : index
      %c0_31 = arith.constant 0 : index
      %55 = vector.load %arg4[%54, %c0_30, %c0_31] : memref<4x32x256xbf16, #tpu.memory_space<vmem>>, vector<1x32x256xbf16>
      %56 = vector.shape_cast %55 : vector<1x32x256xbf16> to vector<32x256xbf16>
      %cst_32 = arith.constant dense<0.000000e+00> : vector<256x256xf32>
      %57 = tpu.matmul %53, %1, %cst_32 {dimension_numbers = #tpu.dot_dimension_numbers<[1], [0], [0], [1], [0, 0, 1, 1], [], []>} : vector<256x5xf32>, vector<5x256xf32>, vector<256x256xf32> -> vector<256x256xf32>
      %58 = arith.truncf %57 : vector<256x256xf32> to vector<256x256xbf16>
      %cst_33 = arith.constant 5.000000e-01 : bf16
      %59 = vector.broadcast %cst_33 : bf16 to vector<256x256xbf16>
      %60 = arith.mulf %58, %59 : vector<256x256xbf16>
      %61 = math.tanh %60 : vector<256x256xbf16>
      %cst_34 = arith.constant 5.000000e-01 : bf16
      %62 = vector.broadcast %cst_34 : bf16 to vector<256x256xbf16>
      %63 = arith.mulf %61, %62 : vector<256x256xbf16>
      %cst_35 = arith.constant 5.000000e-01 : bf16
      %64 = vector.broadcast %cst_35 : bf16 to vector<256x256xbf16>
      %65 = arith.addf %63, %64 : vector<256x256xbf16>
      %66 = arith.mulf %58, %65 : vector<256x256xbf16>
      %cst_36 = arith.constant dense<0.000000e+00> : vector<32x256xf32>
      %67 = tpu.matmul %56, %66, %cst_36 {dimension_numbers = #tpu.dot_dimension_numbers<[1], [0], [0], [1], [0, 0, 1, 1], [], []>} : vector<32x256xbf16>, vector<256x256xbf16>, vector<32x256xf32> -> vector<32x256xf32>
      %68 = arith.addf %arg12, %67 : vector<32x256xf32>
      scf.yield %68 : vector<32x256xf32>
    }
    %c4_i32_4 = arith.constant 4 : i32
    %8 = arith.truncf %7 : vector<32x256xf32> to vector<32x256xbf16>
    %c0_5 = arith.constant 0 : index
    %c0_6 = arith.constant 0 : index
    %9 = vector.load %arg6[%c0_5, %c0_6] : memref<128x128xbf16, #tpu.memory_space<vmem>>, vector<128x128xbf16>
    %c0_7 = arith.constant 0 : index
    %c0_8 = arith.constant 0 : index
    %10 = vector.load %arg7[%c0_7, %c0_8] : memref<1x128xf32, #tpu.memory_space<vmem>>, vector<1x128xf32>
    %c0_9 = arith.constant 0 : index
    %c0_10 = arith.constant 0 : index
    %11 = vector.load %arg8[%c0_9, %c0_10] : memref<128x128xbf16, #tpu.memory_space<vmem>>, vector<128x128xbf16>
    %c0_11 = arith.constant 0 : index
    %c0_12 = arith.constant 0 : index
    %12 = vector.load %arg9[%c0_11, %c0_12] : memref<1x128xf32, #tpu.memory_space<vmem>>, vector<1x128xf32>
    %13 = vector.extract_strided_slice %8 {offsets = [0, 0], sizes = [32, 128], strides = [1, 1]} : vector<32x256xbf16> to vector<32x128xbf16>
    %cst_13 = arith.constant dense<0.000000e+00> : vector<32x128xf32>
    %14 = tpu.matmul %13, %9, %cst_13 {dimension_numbers = #tpu.dot_dimension_numbers<[1], [0], [0], [1], [0, 0, 1, 1], [], []>} : vector<32x128xbf16>, vector<128x128xbf16>, vector<32x128xf32> -> vector<32x128xf32>
    %15 = vector.broadcast %10 : vector<1x128xf32> to vector<32x128xf32>
    %16 = arith.addf %14, %15 : vector<32x128xf32>
    %17 = arith.truncf %16 : vector<32x128xf32> to vector<32x128xbf16>
    %cst_14 = arith.constant 5.000000e-01 : bf16
    %18 = vector.broadcast %cst_14 : bf16 to vector<32x128xbf16>
    %19 = arith.mulf %17, %18 : vector<32x128xbf16>
    %20 = math.tanh %19 : vector<32x128xbf16>
    %cst_15 = arith.constant 5.000000e-01 : bf16
    %21 = vector.broadcast %cst_15 : bf16 to vector<32x128xbf16>
    %22 = arith.mulf %20, %21 : vector<32x128xbf16>
    %cst_16 = arith.constant 5.000000e-01 : bf16
    %23 = vector.broadcast %cst_16 : bf16 to vector<32x128xbf16>
    %24 = arith.addf %22, %23 : vector<32x128xbf16>
    %25 = arith.mulf %17, %24 : vector<32x128xbf16>
    %cst_17 = arith.constant dense<0.000000e+00> : vector<32x128xf32>
    %26 = tpu.matmul %25, %11, %cst_17 {dimension_numbers = #tpu.dot_dimension_numbers<[1], [0], [0], [1], [0, 0, 1, 1], [], []>} : vector<32x128xbf16>, vector<128x128xbf16>, vector<32x128xf32> -> vector<32x128xf32>
    %27 = vector.broadcast %12 : vector<1x128xf32> to vector<32x128xf32>
    %28 = arith.addf %26, %27 : vector<32x128xf32>
    %c0_18 = arith.constant 0 : index
    %c0_19 = arith.constant 0 : index
    %c0_20 = arith.constant 0 : index
    %29 = vector.load %arg10[%c0_18, %c0_19, %c0_20] : memref<1x32x256xf32, #tpu.memory_space<vmem>>, vector<1x32x128xf32>
    %30 = vector.shape_cast %29 : vector<1x32x128xf32> to vector<32x128xf32>
    %31 = vector.shape_cast %28 : vector<32x128xf32> to vector<1x32x128xf32>
    tpu.vector_store %arg10[%c0_18, %c0_19, %c0_20], %31 {strides = array<i32>} : memref<1x32x256xf32, #tpu.memory_space<vmem>>, vector<1x32x128xf32>,
    %32 = vector.extract_strided_slice %8 {offsets = [0, 128], sizes = [32, 128], strides = [1, 1]} : vector<32x256xbf16> to vector<32x128xbf16>
    %cst_21 = arith.constant dense<0.000000e+00> : vector<32x128xf32>
    %33 = tpu.matmul %32, %9, %cst_21 {dimension_numbers = #tpu.dot_dimension_numbers<[1], [0], [0], [1], [0, 0, 1, 1], [], []>} : vector<32x128xbf16>, vector<128x128xbf16>, vector<32x128xf32> -> vector<32x128xf32>
    %34 = vector.broadcast %10 : vector<1x128xf32> to vector<32x128xf32>
    %35 = arith.addf %33, %34 : vector<32x128xf32>
    %36 = arith.truncf %35 : vector<32x128xf32> to vector<32x128xbf16>
    %cst_22 = arith.constant 5.000000e-01 : bf16
    %37 = vector.broadcast %cst_22 : bf16 to vector<32x128xbf16>
    %38 = arith.mulf %36, %37 : vector<32x128xbf16>
    %39 = math.tanh %38 : vector<32x128xbf16>
    %cst_23 = arith.constant 5.000000e-01 : bf16
    %40 = vector.broadcast %cst_23 : bf16 to vector<32x128xbf16>
    %41 = arith.mulf %39, %40 : vector<32x128xbf16>
    %cst_24 = arith.constant 5.000000e-01 : bf16
    %42 = vector.broadcast %cst_24 : bf16 to vector<32x128xbf16>
    %43 = arith.addf %41, %42 : vector<32x128xbf16>
    %44 = arith.mulf %36, %43 : vector<32x128xbf16>
    %cst_25 = arith.constant dense<0.000000e+00> : vector<32x128xf32>
    %45 = tpu.matmul %44, %11, %cst_25 {dimension_numbers = #tpu.dot_dimension_numbers<[1], [0], [0], [1], [0, 0, 1, 1], [], []>} : vector<32x128xbf16>, vector<128x128xbf16>, vector<32x128xf32> -> vector<32x128xf32>
    %46 = vector.broadcast %12 : vector<1x128xf32> to vector<32x128xf32>
    %47 = arith.addf %45, %46 : vector<32x128xf32>
    %c0_26 = arith.constant 0 : index
    %c0_27 = arith.constant 0 : index
    %c128 = arith.constant 128 : index
    %48 = vector.load %arg10[%c0_26, %c0_27, %c128] : memref<1x32x256xf32, #tpu.memory_space<vmem>>, vector<1x32x128xf32>
    %49 = vector.shape_cast %48 : vector<1x32x128xf32> to vector<32x128xf32>
    %50 = vector.shape_cast %47 : vector<32x128xf32> to vector<1x32x128xf32>
    tpu.vector_store %arg10[%c0_26, %c0_27, %c128], %50 {strides = array<i32>} : memref<1x32x256xf32, #tpu.memory_space<vmem>>, vector<1x32x128xf32>,
    return
  }
  func.func @transform_0(%arg0: i32, %arg1: i32) -> (i32, i32, i32) {
    %c0_i32 = arith.constant 0 : i32
    %c0_i32_0 = arith.constant 0 : i32
    return %arg0, %c0_i32, %arg1 : i32, i32, i32
  }
  func.func @transform_1(%arg0: i32, %arg1: i32) -> (i32, i32, i32) {
    %c0_i32 = arith.constant 0 : i32
    %c0_i32_0 = arith.constant 0 : i32
    %c0_i32_1 = arith.constant 0 : i32
    %c0_i32_2 = arith.constant 0 : i32
    return %c0_i32, %c0_i32_0, %c0_i32_1 : i32, i32, i32
  }
  func.func @transform_2(%arg0: i32, %arg1: i32) -> (i32, i32, i32) {
    %c0_i32 = arith.constant 0 : i32
    %c0_i32_0 = arith.constant 0 : i32
    %c0_i32_1 = arith.constant 0 : i32
    %c0_i32_2 = arith.constant 0 : i32
    return %c0_i32, %c0_i32_0, %c0_i32_1 : i32, i32, i32
  }
  func.func @transform_3(%arg0: i32, %arg1: i32) -> (i32, i32) {
    %c0_i32 = arith.constant 0 : i32
    %c0_i32_0 = arith.constant 0 : i32
    %c0_i32_1 = arith.constant 0 : i32
    return %c0_i32, %c0_i32_0 : i32, i32
  }
  func.func @transform_4(%arg0: i32, %arg1: i32) -> (i32, i32) {
    %c0_i32 = arith.constant 0 : i32
    %c0_i32_0 = arith.constant 0 : i32
    %c0_i32_1 = arith.constant 0 : i32
    return %c0_i32, %c0_i32_0 : i32, i32
  }
  func.func @transform_5(%arg0: i32, %arg1: i32) -> (i32, i32) {
    %c0_i32 = arith.constant 0 : i32
    %c0_i32_0 = arith.constant 0 : i32
    %c0_i32_1 = arith.constant 0 : i32
    return %c0_i32, %c0_i32_0 : i32, i32
  }
  func.func @transform_6(%arg0: i32, %arg1: i32) -> (i32, i32) {
    %c0_i32 = arith.constant 0 : i32
    %c0_i32_0 = arith.constant 0 : i32
    %c0_i32_1 = arith.constant 0 : i32
    return %c0_i32, %c0_i32_0 : i32, i32
  }
  func.func @transform_7(%arg0: i32, %arg1: i32) -> (i32, i32) {
    %c0_i32 = arith.constant 0 : i32
    %c0_i32_0 = arith.constant 0 : i32
    %c0_i32_1 = arith.constant 0 : i32
    return %c0_i32, %c0_i32_0 : i32, i32
  }
  func.func @transform_8(%arg0: i32, %arg1: i32) -> (i32, i32, i32) {
    %c0_i32 = arith.constant 0 : i32
    %c0_i32_0 = arith.constant 0 : i32
    return %arg0, %c0_i32, %arg1 : i32, i32, i32
  }
}

</mosaic_0001>

<bundles_post_ra>
// kernel: calculator_forward.1
= control target key start
LH: loop header
LB: loop body
LE: loop exit
PB: predicated region body
PF: predicated region fallthrough
CT: control target
= control target key end

     0   :  { %s2090_s27 = smov 0   ;;  %s2092_s28 = smov 0   ;;  %s2413_s0 = inlined_call_operand.vmem [shape: f32[2,5,256], index: 0, kind: input, shape index: {}]   ;;  %s2414_s1 = inlined_call_operand.vmem [shape: f32[4,256,5], index: 1, kind: input, shape index: {}]   ;;  %s2415_s2 = inlined_call_operand.vmem [shape: bf16[4,32,256], index: 2, kind: input, shape index: {}]   ;;  %s2416_s3 = inlined_call_operand.vmem [shape: f32[32,1], index: 3, kind: input, shape index: {}]   ;;  %s2417_s4 = inlined_call_operand.vmem [shape: bf16[128,128], index: 4, kind: input, shape index: {}]   ;;  %s2418_s5 = inlined_call_operand.vmem [shape: f32[1,128], index: 5, kind: input, shape index: {}]   ;;  %s2419_s6 = inlined_call_operand.vmem [shape: bf16[128,128], index: 6, kind: input, shape index: {}]   ;;  %s2420_s7 = inlined_call_operand.vmem [shape: f32[1,128], index: 7, kind: input, shape index: {}]   ;;  %s2421_s8 = inlined_call_operand.vmem [shape: f32[2,32,256], index: 8, kind: output, shape index: {}]  }
   0x1   :  { %s2094_s29 = smov 0  }
   0x2 LB: > { %s30_s30 = sadd.s32 1, %s2001_s28  ;;  %p1564_p0 = scmp.ge.s32.totalorder %s2005_s29, 1  ;;  %s2005_s29 = sphi %s2094_s29, %s18_s29   ;;  %s2001_s28 = sphi %s2092_s28, %s2437_s28   ;;  %s1997_s27 = sphi %s2090_s27, %s2436_s27  }
   0x3   : > { %p32_p1 = scmp.ge.s32.totalorder %s30_s30, 2  ;;  %p283_p2 = scmp.lt.s32.totalorder %s2005_s29, 3 }
   0x5   : > { %s2439_s30 = smov (%p32_p1, %s30_s30), 0  ;;  %p284_p3 = pnand %p1564_p0, %p283_p2 }
   0x6   : > { %v351_v0 = vld [vmem:[%s2416_s3 + $0x10] sm:$0xff] (!%p284_p3)  ;;  %v349_v1 = vld [vmem:[%s2416_s3] sm:$0xff] (!%p284_p3)  ;;  %p326_p4 = scmp.lt.s32.totalorder (!%p284_p3), %s1997_s27, 1  ;;  %v2043_v2 = vmov (!%p284_p3), 0   ;;  %v352_v3 = vld [vmem:[%s2416_s3 + $0x18] sm:$0xff] (!%p284_p3)  ;;  %s2148_s25 = smov (!%p284_p3), 0  }
   0x7   : > { %287 = sbr.rel (%p284_p3) target bundleno = 1237 (0x4d5), region = 52  ;;  %1852 = vset.pattern.permute.xlu1 (!%p284_p3), %v2043_v2  ;;  %1851 = vset.pattern.permute.xlu0 (!%p284_p3), %v2043_v2  ;;  %v350_v4 = vld [vmem:[%s2416_s3 + $0x8] sm:$0xff] (!%p284_p3) }
   0x8   : > { %365 = vperm.xlu1 (!%p284_p3), %1852, %v351_v0   ;;  %355 = vperm.xlu0 (!%p284_p3), %1851, %v349_v1  }
   0xc   : > { %370 = vperm.xlu1 (!%p284_p3), %1852, %v352_v3   ;;  %360 = vperm.xlu0 (!%p284_p3), %1851, %v350_v4  }
   0xe   : > { %s2441_s27 = smov (!%p326_p4, %s1997_s27), 1 }
   0xf   : > { %s1630_s17 = sshll.u32 %s2441_s27, 4  ;;  %s1631_s18 = sshll.u32 %s2441_s27, 6 }
  0x10   : > { %s333_s21 = scalar_lea.vmem %s2413_s0, %s1630_s17  ;;  %s2126_s24 = scalar_lea.vmem %s2421_s8, %s1631_s18 }
  0x11   : > { %v2128_v5 = vld [vmem:[%s333_s21] sm:$0x1f]  ;;  %v2130_v6 = vld [vmem:[%s333_s21 + $0x8] sm:$0x1f] }
  0x87   : > { %v366_v7 = vpop.permute.xlu1 %365   ;;  %v356_v8 = vpop.permute.xlu0 %355  }
  0x88   : > { %v2423_v12 = vmov %v366_v7  ;;  %v2425_v14 = vmov %v356_v8 }
  0x8b   : > { %v371_v9 = vpop.permute.xlu1 %370   ;;  %v361_v10 = vpop.permute.xlu0 %360  }
  0x8c   : > { %v2422_v11 = vmov %v371_v9  ;;  %v2424_v13 = vmov %v361_v10 }
  0x8d LB: >> { %vm529_vm0 = vcmask 1044480   ;;  %v2044_v15 = vmov 0.0   ;;  %s1569_s26 = sshll.u32 %s2041_s25, 8  ;;  %vm432_vm1 = vcmask 39936   ;;  %s1632_s11 = sshll.u32 %s2041_s25, 5  ;;  %s2041_s25 = sphi %s2148_s25, %s382_s25   ;;  %v2037_v8 = vphi %v356_v8, %v2435_v8   ;;  %v2033_v14 = vphi %v2425_v14, %v2434_v14   ;;  %v2029_v10 = vphi %v361_v10, %v2433_v10   ;;  %v2025_v13 = vphi %v2424_v13, %v2432_v13   ;;  %v2021_v7 = vphi %v366_v7, %v2431_v7   ;;  %v2017_v12 = vphi %v2423_v12, %v2430_v12   ;;  %v2013_v9 = vphi %v371_v9, %v2429_v9   ;;  %v2009_v11 = vphi %v2422_v11, %v2428_v11  }
  0x8e   : >> { %1572 = vmatprep.subr.msk.mxu0 %vm529_vm0, %v2130_v6  ;;  %600 = vmatprep.mubr.f32.mxu0 %v2044_v15  ;;  %s2184_s10 = scalar_lea.vmem %s2414_s1, %s1569_s26  ;;  %s2285_s14 = scalar_lea.vmem %s2415_s2, %s1632_s11 }
  0x8f   : >> { %1573 = vmatpush1.msk.msra.mxu0 %vm529_vm0, %v2128_v5  ;;  %v393_v16 = vld [vmem:[%s2184_s10] sm:$0xff]  ;;  %v394_v17 = vld [vmem:[%s2184_s10 + $0x8] sm:$0xff]  ;;  %v395_v18 = vld [vmem:[%s2184_s10 + $0x10] sm:$0xff]  ;;  %s382_s25 = sadd.s32 1, %s2041_s25  }
  0x90   : >> { %1574 = vmatmul.mubr.msk.f32.vlgmr.msra.gmra.mrb[0].mxu0 %vm432_vm1, %v393_v16  ;;  %v396_v19 = vld [vmem:[%s2184_s10 + $0x18] sm:$0xff]  ;;  %v397_v20 = vld [vmem:[%s2184_s10 + $0x20] sm:$0xff]  ;;  %v398_v21 = vld [vmem:[%s2184_s10 + $0x28] sm:$0xff]  ;;  %p379_p5 = scmp.ge.s32.totalorder %s382_s25, 4  }
  0x91   : >> { %606 = vmatprep.mubr.f32.mxu0 %v2044_v15  ;;  %v399_v22 = vld [vmem:[%s2184_s10 + $0x30] sm:$0xff]  ;;  %v400_v23 = vld [vmem:[%s2184_s10 + $0x38] sm:$0xff]  ;;  %v401_v24 = vld [vmem:[%s2184_s10 + $0x40] sm:$0xff] }
  0x92   : >> { %v402_v25 = vld [vmem:[%s2184_s10 + $0x48] sm:$0xff]  ;;  %v403_v26 = vld [vmem:[%s2184_s10 + $0x50] sm:$0xff]  ;;  %v404_v27 = vld [vmem:[%s2184_s10 + $0x58] sm:$0xff] }
  0x93   : >> { %v405_v28 = vld [vmem:[%s2184_s10 + $0x60] sm:$0xff]  ;;  %v406_v29 = vld [vmem:[%s2184_s10 + $0x68] sm:$0xff]  ;;  %v407_v30 = vld [vmem:[%s2184_s10 + $0x70] sm:$0xff] }
  0x94   : >> { %1575 = vmatmul.mubr.msk.f32.gmra.mrb[2].mxu0 %vm432_vm1, %v394_v17  ;;  %v408_v31 = vld [vmem:[%s2184_s10 + $0x78] sm:$0xff]  ;;  %v409_v32 = vld [vmem:[%s2184_s10 + $0x80] sm:$0xff]  ;;  %v410_v33 = vld [vmem:[%s2184_s10 + $0x88] sm:$0xff] }
  0x95   : >> { %612 = vmatprep.mubr.f32.mxu0 %v2044_v15  ;;  %v411_v34 = vld [vmem:[%s2184_s10 + $0x90] sm:$0xff]  ;;  %v412_v35 = vld [vmem:[%s2184_s10 + $0x98] sm:$0xff]  ;;  %v413_v36 = vld [vmem:[%s2184_s10 + $0xa0] sm:$0xff] }
  0x96   : >> { %v414_v37 = vld [vmem:[%s2184_s10 + $0xa8] sm:$0xff]  ;;  %v415_v38 = vld [vmem:[%s2184_s10 + $0xb0] sm:$0xff]  ;;  %v416_v39 = vld [vmem:[%s2184_s10 + $0xb8] sm:$0xff] }
  0x97   : >> { %v417_v40 = vld [vmem:[%s2184_s10 + $0xc0] sm:$0xff]  ;;  %v418_v41 = vld [vmem:[%s2184_s10 + $0xc8] sm:$0xff]  ;;  %v419_v42 = vld [vmem:[%s2184_s10 + $0xd0] sm:$0xff] }
  0x98   : >> { %1576 = vmatmul.mubr.msk.f32.gmra.mrb[4].mxu0 %vm432_vm1, %v395_v18  ;;  %v420_v43 = vld [vmem:[%s2184_s10 + $0xd8] sm:$0xff]  ;;  %v421_v44 = vld [vmem:[%s2184_s10 + $0xe0] sm:$0xff]  ;;  %v422_v45 = vld [vmem:[%s2184_s10 + $0xe8] sm:$0xff] }
  0x99   : >> { %618 = vmatprep.mubr.f32.mxu0 %v2044_v15  ;;  %v423_v46 = vld [vmem:[%s2184_s10 + $0xf0] sm:$0xff]  ;;  %v424_v47 = vld [vmem:[%s2184_s10 + $0xf8] sm:$0xff]  ;;  %v2343_v6 = vld [vmem:[%s2419_s6] sm:$0xff] (%p379_p5)  }
  0x9a   : > { %v1926_v5 = vld [vmem:[%s2417_s4 + $0x18] sm:$0xff] (%p379_p5)  }
  0x9c   : >> { %1577 = vmatmul.mubr.msk.f32.gmra.mrb[6].mxu0 %vm432_vm1, %v396_v19 }
  0x9d   : >> { %624 = vmatprep.mubr.f32.mxu0 %v2044_v15 }
  0xa0   : >> { %1578 = vmatmul.mubr.msk.f32.gmra.mrb[8].mxu0 %vm432_vm1, %v397_v20  ;;  %v1855_v20 = vld [vmem:[%s2285_s14 + $0x4] ss:$8 sps:$4 sm:$0xff]  }
  0xa1   : >> { %630 = vmatprep.mubr.f32.mxu0 %v2044_v15  ;;  %1037 = vmatprep.mubr.bf16.mxu1 %v1855_v20 }
  0xa4   : >> { %1579 = vmatmul.mubr.msk.f32.gmra.mrb[10].mxu0 %vm432_vm1, %v398_v21 }
  0xa5   : >> { %636 = vmatprep.mubr.f32.mxu0 %v2044_v15 }
  0xa8   : >> { %1580 = vmatmul.mubr.msk.f32.gmra.mrb[12].mxu0 %vm432_vm1, %v399_v22 }
  0xa9   : >> { %642 = vmatprep.mubr.f32.mxu0 %v2044_v15 }
  0xac   : >> { %1581 = vmatmul.mubr.msk.f32.gmra.mrb[14].mxu0 %vm432_vm1, %v400_v23 }
  0xad   : >> { %648 = vmatprep.mubr.f32.mxu0 %v2044_v15 }
  0xb0   : >> { %1582 = vmatmul.mubr.msk.f32.gmra.mrb[16].mxu0 %vm432_vm1, %v401_v24 }
  0xb1   : >> { %654 = vmatprep.mubr.f32.mxu0 %v2044_v15 }
  0xb4   : >> { %1583 = vmatmul.mubr.msk.f32.gmra.mrb[18].mxu0 %vm432_vm1, %v402_v25 }
  0xb5   : >> { %660 = vmatprep.mubr.f32.mxu0 %v2044_v15 }
  0xb8   : >> { %1584 = vmatmul.mubr.msk.f32.gmra.mrb[20].mxu0 %vm432_vm1, %v403_v26 }
  0xb9   : >> { %666 = vmatprep.mubr.f32.mxu0 %v2044_v15 }
  0xbc   : >> { %1585 = vmatmul.mubr.msk.f32.gmra.mrb[22].mxu0 %vm432_vm1, %v404_v27 }
  0xbd   : >> { %672 = vmatprep.mubr.f32.mxu0 %v2044_v15 }
  0xc0   : >> { %1586 = vmatmul.mubr.msk.f32.gmra.mrb[24].mxu0 %vm432_vm1, %v405_v28 }
  0xc1   : >> { %678 = vmatprep.mubr.f32.mxu0 %v2044_v15 }
  0xc4   : >> { %1587 = vmatmul.mubr.msk.f32.gmra.mrb[26].mxu0 %vm432_vm1, %v406_v29 }
  0xc5   : >> { %684 = vmatprep.mubr.f32.mxu0 %v2044_v15 }
  0xc8   : >> { %1588 = vmatmul.mubr.msk.f32.gmra.mrb[28].mxu0 %vm432_vm1, %v407_v30 }
  0xc9   : >> { %690 = vmatprep.mubr.f32.mxu0 %v2044_v15 }
  0xcc   : >> { %1589 = vmatmul.mubr.msk.f32.gmra.mrb[30].mxu0 %vm432_vm1, %v408_v31 }
  0xcd   : >> { %696 = vmatprep.mubr.f32.mxu0 %v2044_v15 }
  0xd0   : >> { %1590 = vmatmul.mubr.msk.f32.gmra.mrb[32].mxu0 %vm432_vm1, %v409_v32 }
  0xd1   : >> { %702 = vmatprep.mubr.f32.mxu0 %v2044_v15 }
  0xd4   : >> { %1591 = vmatmul.mubr.msk.f32.gmra.mrb[34].mxu0 %vm432_vm1, %v410_v33 }
  0xd5   : >> { %708 = vmatprep.mubr.f32.mxu0 %v2044_v15 }
  0xd8   : >> { %1592 = vmatmul.mubr.msk.f32.gmra.mrb[36].mxu0 %vm432_vm1, %v411_v34 }
  0xd9   : >> { %714 = vmatprep.mubr.f32.mxu0 %v2044_v15 }
  0xdc   : >> { %1593 = vmatmul.mubr.msk.f32.gmra.mrb[38].mxu0 %vm432_vm1, %v412_v35 }
  0xdd   : >> { %720 = vmatprep.mubr.f32.mxu0 %v2044_v15 }
  0xe0   : >> { %1594 = vmatmul.mubr.msk.f32.gmra.mrb[40].mxu0 %vm432_vm1, %v413_v36 }
  0xe1   : >> { %726 = vmatprep.mubr.f32.mxu0 %v2044_v15 }
  0xe4   : >> { %1595 = vmatmul.mubr.msk.f32.gmra.mrb[42].mxu0 %vm432_vm1, %v414_v37 }
  0xe5   : >> { %732 = vmatprep.mubr.f32.mxu0 %v2044_v15 }
  0xe8   : >> { %1596 = vmatmul.mubr.msk.f32.gmra.mrb[44].mxu0 %vm432_vm1, %v415_v38 }
  0xe9   : >> { %738 = vmatprep.mubr.f32.mxu0 %v2044_v15 }
  0xec   : >> { %1597 = vmatmul.mubr.msk.f32.gmra.mrb[46].mxu0 %vm432_vm1, %v416_v39 }
  0xed   : >> { %744 = vmatprep.mubr.f32.mxu0 %v2044_v15 }
  0xf0   : >> { %1598 = vmatmul.mubr.msk.f32.gmra.mrb[48].mxu0 %vm432_vm1, %v417_v40 }
  0xf1   : >> { %750 = vmatprep.mubr.f32.mxu0 %v2044_v15 }
  0xf4   : >> { %1599 = vmatmul.mubr.msk.f32.gmra.mrb[50].mxu0 %vm432_vm1, %v418_v41 }
  0xf5   : >> { %756 = vmatprep.mubr.f32.mxu0 %v2044_v15 }
  0xf8   : >> { %1600 = vmatmul.mubr.msk.f32.gmra.mrb[52].mxu0 %vm432_vm1, %v419_v42 }
  0xf9   : >> { %762 = vmatprep.mubr.f32.mxu0 %v2044_v15 }
  0xfc   : >> { %1601 = vmatmul.mubr.msk.f32.gmra.mrb[54].mxu0 %vm432_vm1, %v420_v43 }
  0xfd   : >> { %768 = vmatprep.mubr.f32.mxu0 %v2044_v15 }
 0x100   : >> { %1602 = vmatmul.mubr.msk.f32.gmra.mrb[56].mxu0 %vm432_vm1, %v421_v44 }
 0x101   : >> { %774 = vmatprep.mubr.f32.mxu0 %v2044_v15 }
 0x104   : >> { %1603 = vmatmul.mubr.msk.f32.gmra.mrb[58].mxu0 %vm432_vm1, %v422_v45 }
 0x105   : >> { %780 = vmatprep.mubr.f32.mxu0 %v2044_v15 }
 0x108   : >> { %1604 = vmatmul.mubr.msk.f32.gmra.mrb[60].mxu0 %vm432_vm1, %v423_v46 }
 0x109   : >> { %786 = vmatprep.mubr.f32.mxu0 %v2044_v15 }
 0x10c   : >> { %1605 = vmatmul.mubr.msk.f32.gmra.mrb[62].mxu0 %vm432_vm1, %v424_v47 }
 0x163   : >> { %v602_v48 = vpop.f32.mrb[0].mxu0 }
 0x164   : >> { %v604_v49 = vpop.f32.mrb[1].mxu0 }
 0x167   : >> { %v608_v50 = vpop.f32.mrb[2].mxu0 }
 0x168   : >> { %v793_v51 = vpack.c.bf16 %v608_v50, %v602_v48  ;;  %v610_v52 = vpop.f32.mrb[3].mxu0 }
 0x169   : >> { %v794_v53 = vpack.c.bf16 %v610_v52, %v604_v49 }
 0x16a   : >> { %v825_v54 = vmul.bf16 1056980736, %v793_v51 }
 0x16b   : >> { %v826_v55 = vmul.bf16 1056980736, %v794_v53  ;;  %v614_v56 = vpop.f32.mrb[4].mxu0 }
 0x16c   : >> { %1859 = vtanh.bf16 %v825_v54  ;;  %v616_v57 = vpop.f32.mrb[5].mxu0 }
 0x16d   : >> { %1861 = vtanh.bf16 %v826_v55 }
 0x16f   : >> { %v620_v58 = vpop.f32.mrb[6].mxu0 }
 0x170   : >> { %v795_v59 = vpack.c.bf16 %v620_v58, %v614_v56  ;;  %v622_v60 = vpop.f32.mrb[7].mxu0 }
 0x171   : >> { %v796_v61 = vpack.c.bf16 %v622_v60, %v616_v57 }
 0x172   : >> { %v827_v62 = vmul.bf16 1056980736, %v795_v59 }
 0x173   : >> { %v828_v63 = vmul.bf16 1056980736, %v796_v61  ;;  %v626_v0 = vpop.f32.mrb[8].mxu0 }
 0x174   : >> { %1863 = vtanh.bf16 %v827_v62  ;;  %v628_v1 = vpop.f32.mrb[9].mxu0 }
 0x175   : >> { %1865 = vtanh.bf16 %v828_v63 }
 0x177   : >> { %v1860_v2 = vpop.eup %1859  ;;  %v632_v3 = vpop.f32.mrb[10].mxu0 }
 0x178   : >> { %v1862_v4 = vpop.eup %1861  ;;  %v2287_v15 = vpack.c.bf16 %v632_v3, %v626_v0  ;;  %v634_v16 = vpop.f32.mrb[11].mxu0  ;;  %v889_v17 = vmul.bf16 1056980736, %v1860_v2 }
 0x179   : >> { %v798_v18 = vpack.c.bf16 %v634_v16, %v628_v1  ;;  %v890_v19 = vmul.bf16 1056980736, %v1862_v4 }
 0x17a   : >> { %v829_v21 = vmul.bf16 1056980736, %v2287_v15  ;;  %v921_v22 = vadd.bf16 1056980736, %v889_v17 }
 0x17b   : >> { %v830_v23 = vmul.bf16 1056980736, %v798_v18  ;;  %v638_v24 = vpop.f32.mrb[12].mxu0  ;;  %v922_v25 = vadd.bf16 1056980736, %v890_v19 }
 0x17c   : >> { %1867 = vtanh.bf16 %v829_v21  ;;  %v640_v26 = vpop.f32.mrb[13].mxu0  ;;  %v953_v28 = vmul.bf16 %v921_v22, %v793_v51 }
 0x17d   : >> { %1869 = vtanh.bf16 %v830_v23  ;;  %v954_v27 = vmul.bf16 %v922_v25, %v794_v53 }
 0x17f   : >> { %v1864_v29 = vpop.eup %1863  ;;  %v644_v30 = vpop.f32.mrb[14].mxu0  ;;  %1005 = vmatprep.subr.bf16.mxu1 %v954_v27 }
 0x180   : >> { %v1866_v31 = vpop.eup %1865  ;;  %v891_v32 = vmul.bf16 1056980736, %v1864_v29  ;;  %v799_v33 = vpack.c.bf16 %v644_v30, %v638_v24  ;;  %v646_v34 = vpop.f32.mrb[15].mxu0  ;;  %1006 = vmatpush1.bf16.msra.mxu1 %v953_v28 }
 0x181   : >> { %v892_v35 = vmul.bf16 1056980736, %v1866_v31  ;;  %v800_v36 = vpack.c.bf16 %v646_v34, %v640_v26 }
 0x182   : >> { %v923_v37 = vadd.bf16 1056980736, %v891_v32  ;;  %v831_v38 = vmul.bf16 1056980736, %v799_v33 }
 0x183   : >> { %v924_v39 = vadd.bf16 1056980736, %v892_v35  ;;  %v832_v40 = vmul.bf16 1056980736, %v800_v36  ;;  %v650_v41 = vpop.f32.mrb[16].mxu0 }
 0x184   : >> { %1871 = vtanh.bf16 %v831_v38  ;;  %v652_v42 = vpop.f32.mrb[17].mxu0  ;;  %v955_v44 = vmul.bf16 %v923_v37, %v795_v59 }
 0x185   : >> { %v956_v43 = vmul.bf16 %v924_v39, %v796_v61  ;;  %1873 = vtanh.bf16 %v832_v40 }
 0x187   : >> { %v1868_v45 = vpop.eup %1867  ;;  %v656_v46 = vpop.f32.mrb[18].mxu0  ;;  %1007 = vmatprep.subr.bf16.mxu1 %v956_v43 }
 0x188   : >> { %v1870_v47 = vpop.eup %1869  ;;  %v893_v48 = vmul.bf16 1056980736, %v1868_v45  ;;  %v801_v49 = vpack.c.bf16 %v656_v46, %v650_v41  ;;  %v658_v50 = vpop.f32.mrb[19].mxu0  ;;  %1008 = vmatpush1.bf16.msra.mxu1 %v955_v44 }
 0x189   : >> { %v894_v51 = vmul.bf16 1056980736, %v1870_v47  ;;  %v802_v52 = vpack.c.bf16 %v658_v50, %v652_v42 }
 0x18a   : >> { %v925_v53 = vadd.bf16 1056980736, %v893_v48  ;;  %v833_v54 = vmul.bf16 1056980736, %v801_v49 }
 0x18b   : >> { %v926_v55 = vadd.bf16 1056980736, %v894_v51  ;;  %v834_v56 = vmul.bf16 1056980736, %v802_v52  ;;  %v662_v57 = vpop.f32.mrb[20].mxu0 }
 0x18c   : >> { %1875 = vtanh.bf16 %v833_v54  ;;  %v664_v58 = vpop.f32.mrb[21].mxu0  ;;  %v957_v59 = vmul.bf16 %v925_v53, %v2287_v15 }
 0x18d   : >> { %v958_v60 = vmul.bf16 %v926_v55, %v798_v18  ;;  %1877 = vtanh.bf16 %v834_v56 }
 0x18f   : >> { %v1872_v61 = vpop.eup %1871  ;;  %v668_v62 = vpop.f32.mrb[22].mxu0  ;;  %1009 = vmatprep.subr.bf16.mxu1 %v958_v60 }
 0x190   : >> { %v1874_v63 = vpop.eup %1873  ;;  %v895_v0 = vmul.bf16 1056980736, %v1872_v61  ;;  %v803_v1 = vpack.c.bf16 %v668_v62, %v662_v57  ;;  %v670_v2 = vpop.f32.mrb[23].mxu0  ;;  %1010 = vmatpush1.bf16.msra.mxu1 %v957_v59 }
 0x191   : >> { %v896_v3 = vmul.bf16 1056980736, %v1874_v63  ;;  %v804_v4 = vpack.c.bf16 %v670_v2, %v664_v58 }
 0x192   : >> { %v927_v16 = vadd.bf16 1056980736, %v895_v0  ;;  %v835_v17 = vmul.bf16 1056980736, %v803_v1 }
 0x193   : >> { %v928_v19 = vadd.bf16 1056980736, %v896_v3  ;;  %v836_v20 = vmul.bf16 1056980736, %v804_v4  ;;  %v674_v21 = vpop.f32.mrb[24].mxu0 }
 0x194   : >> { %1879 = vtanh.bf16 %v835_v17  ;;  %v676_v18 = vpop.f32.mrb[25].mxu0  ;;  %v959_v15 = vmul.bf16 %v927_v16, %v799_v33 }
 0x195   : >> { %v960_v22 = vmul.bf16 %v928_v19, %v800_v36  ;;  %1881 = vtanh.bf16 %v836_v20 }
 0x197   : >> { %v1876_v23 = vpop.eup %1875  ;;  %v680_v24 = vpop.f32.mrb[26].mxu0  ;;  %1011 = vmatprep.subr.bf16.mxu1 %v960_v22 }
 0x198   : >> { %v1878_v25 = vpop.eup %1877  ;;  %v897_v26 = vmul.bf16 1056980736, %v1876_v23  ;;  %v805_v27 = vpack.c.bf16 %v680_v24, %v674_v21  ;;  %v682_v28 = vpop.f32.mrb[27].mxu0  ;;  %1012 = vmatpush1.bf16.msra.mxu1 %v959_v15 }
 0x199   : >> { %v898_v29 = vmul.bf16 1056980736, %v1878_v25  ;;  %v806_v30 = vpack.c.bf16 %v682_v28, %v676_v18 }
 0x19a   : >> { %v929_v31 = vadd.bf16 1056980736, %v897_v26  ;;  %v837_v32 = vmul.bf16 1056980736, %v805_v27 }
 0x19b   : >> { %v930_v34 = vadd.bf16 1056980736, %v898_v29  ;;  %v838_v35 = vmul.bf16 1056980736, %v806_v30  ;;  %v686_v37 = vpop.f32.mrb[28].mxu0 }
 0x19c   : >> { %1883 = vtanh.bf16 %v837_v32  ;;  %v688_v38 = vpop.f32.mrb[29].mxu0  ;;  %v961_v33 = vmul.bf16 %v929_v31, %v801_v49 }
 0x19d   : >> { %v962_v36 = vmul.bf16 %v930_v34, %v802_v52  ;;  %1885 = vtanh.bf16 %v838_v35 }
 0x19f   : >> { %v1880_v39 = vpop.eup %1879  ;;  %v692_v40 = vpop.f32.mrb[30].mxu0  ;;  %1013 = vmatprep.subr.bf16.mxu1 %v962_v36 }
 0x1a0   : >> { %v1882_v41 = vpop.eup %1881  ;;  %v899_v42 = vmul.bf16 1056980736, %v1880_v39  ;;  %v807_v43 = vpack.c.bf16 %v692_v40, %v686_v37  ;;  %v694_v44 = vpop.f32.mrb[31].mxu0  ;;  %1014 = vmatpush1.bf16.msra.mxu1 %v961_v33 }
 0x1a1   : >> { %v900_v45 = vmul.bf16 1056980736, %v1882_v41  ;;  %v808_v46 = vpack.c.bf16 %v694_v44, %v688_v38 }
 0x1a2   : >> { %v931_v47 = vadd.bf16 1056980736, %v899_v42  ;;  %v839_v48 = vmul.bf16 1056980736, %v807_v43 }
 0x1a3   : >> { %v932_v50 = vadd.bf16 1056980736, %v900_v45  ;;  %v840_v51 = vmul.bf16 1056980736, %v808_v46  ;;  %v698_v53 = vpop.f32.mrb[32].mxu0 }
 0x1a4   : >> { %1887 = vtanh.bf16 %v839_v48  ;;  %v700_v54 = vpop.f32.mrb[33].mxu0  ;;  %v963_v49 = vmul.bf16 %v931_v47, %v803_v1 }
 0x1a5   : >> { %v964_v52 = vmul.bf16 %v932_v50, %v804_v4  ;;  %1889 = vtanh.bf16 %v840_v51 }
 0x1a7   : >> { %v1884_v55 = vpop.eup %1883  ;;  %v704_v56 = vpop.f32.mrb[34].mxu0  ;;  %1015 = vmatprep.subr.bf16.mxu1 %v964_v52 }
 0x1a8   : >> { %v1886_v57 = vpop.eup %1885  ;;  %v901_v58 = vmul.bf16 1056980736, %v1884_v55  ;;  %v809_v60 = vpack.c.bf16 %v704_v56, %v698_v53  ;;  %v706_v59 = vpop.f32.mrb[35].mxu0  ;;  %1016 = vmatpush1.bf16.msra.mxu1 %v963_v49 }
 0x1a9   : >> { %v902_v61 = vmul.bf16 1056980736, %v1886_v57  ;;  %v810_v62 = vpack.c.bf16 %v706_v59, %v700_v54 }
 0x1aa   : >> { %v933_v63 = vadd.bf16 1056980736, %v901_v58  ;;  %v841_v0 = vmul.bf16 1056980736, %v809_v60 }
 0x1ab   : >> { %v934_v2 = vadd.bf16 1056980736, %v902_v61  ;;  %v842_v3 = vmul.bf16 1056980736, %v810_v62  ;;  %v710_v16 = vpop.f32.mrb[36].mxu0 }
 0x1ac   : >> { %1891 = vtanh.bf16 %v841_v0  ;;  %v712_v17 = vpop.f32.mrb[37].mxu0  ;;  %v965_v1 = vmul.bf16 %v933_v63, %v805_v27 }
 0x1ad   : >> { %v966_v4 = vmul.bf16 %v934_v2, %v806_v30  ;;  %1893 = vtanh.bf16 %v842_v3 }
 0x1af   : >> { %v1888_v19 = vpop.eup %1887  ;;  %v716_v20 = vpop.f32.mrb[38].mxu0  ;;  %1017 = vmatprep.subr.bf16.mxu1 %v966_v4 }
 0x1b0   : >> { %v1890_v21 = vpop.eup %1889  ;;  %v903_v18 = vmul.bf16 1056980736, %v1888_v19  ;;  %v811_v22 = vpack.c.bf16 %v716_v20, %v710_v16  ;;  %v718_v15 = vpop.f32.mrb[39].mxu0  ;;  %1018 = vmatpush1.bf16.msra.mxu1 %v965_v1 }
 0x1b1   : >> { %v904_v23 = vmul.bf16 1056980736, %v1890_v21  ;;  %v812_v24 = vpack.c.bf16 %v718_v15, %v712_v17 }
 0x1b2   : >> { %v935_v25 = vadd.bf16 1056980736, %v903_v18  ;;  %v843_v26 = vmul.bf16 1056980736, %v811_v22 }
 0x1b3   : >> { %v936_v28 = vadd.bf16 1056980736, %v904_v23  ;;  %v844_v29 = vmul.bf16 1056980736, %v812_v24  ;;  %v722_v31 = vpop.f32.mrb[40].mxu0 }
 0x1b4   : >> { %1895 = vtanh.bf16 %v843_v26  ;;  %v724_v32 = vpop.f32.mrb[41].mxu0  ;;  %v967_v27 = vmul.bf16 %v935_v25, %v807_v43 }
 0x1b5   : >> { %v968_v30 = vmul.bf16 %v936_v28, %v808_v46  ;;  %1897 = vtanh.bf16 %v844_v29 }
 0x1b7   : >> { %v1892_v34 = vpop.eup %1891  ;;  %v728_v35 = vpop.f32.mrb[42].mxu0  ;;  %1019 = vmatprep.subr.bf16.mxu1 %v968_v30 }
 0x1b8   : >> { %v1894_v37 = vpop.eup %1893  ;;  %v905_v38 = vmul.bf16 1056980736, %v1892_v34  ;;  %v813_v36 = vpack.c.bf16 %v728_v35, %v722_v31  ;;  %v730_v33 = vpop.f32.mrb[43].mxu0  ;;  %1020 = vmatpush1.bf16.msra.mxu1 %v967_v27 }
 0x1b9   : >> { %v906_v39 = vmul.bf16 1056980736, %v1894_v37  ;;  %v814_v40 = vpack.c.bf16 %v730_v33, %v724_v32 }
 0x1ba   : >> { %v937_v41 = vadd.bf16 1056980736, %v905_v38  ;;  %v845_v42 = vmul.bf16 1056980736, %v813_v36 }
 0x1bb   : >> { %v938_v44 = vadd.bf16 1056980736, %v906_v39  ;;  %v846_v45 = vmul.bf16 1056980736, %v814_v40  ;;  %v734_v47 = vpop.f32.mrb[44].mxu0 }
 0x1bc   : >> { %1899 = vtanh.bf16 %v845_v42  ;;  %v736_v48 = vpop.f32.mrb[45].mxu0  ;;  %v969_v43 = vmul.bf16 %v937_v41, %v809_v60 }
 0x1bd   : >> { %v970_v46 = vmul.bf16 %v938_v44, %v810_v62  ;;  %1901 = vtanh.bf16 %v846_v45 }
 0x1bf   : >> { %v1896_v50 = vpop.eup %1895  ;;  %v740_v51 = vpop.f32.mrb[46].mxu0  ;;  %1021 = vmatprep.subr.bf16.mxu1 %v970_v46 }
 0x1c0   : >> { %v1898_v53 = vpop.eup %1897  ;;  %v907_v54 = vmul.bf16 1056980736, %v1896_v50  ;;  %v815_v52 = vpack.c.bf16 %v740_v51, %v734_v47  ;;  %v742_v49 = vpop.f32.mrb[47].mxu0  ;;  %1022 = vmatpush1.bf16.msra.mxu1 %v969_v43 }
 0x1c1   : >> { %v908_v55 = vmul.bf16 1056980736, %v1898_v53  ;;  %v816_v56 = vpack.c.bf16 %v742_v49, %v736_v48 }
 0x1c2   : >> { %v939_v57 = vadd.bf16 1056980736, %v907_v54  ;;  %v847_v58 = vmul.bf16 1056980736, %v815_v52 }
 0x1c3   : >> { %v940_v59 = vadd.bf16 1056980736, %v908_v55  ;;  %v848_v61 = vmul.bf16 1056980736, %v816_v56  ;;  %v746_v63 = vpop.f32.mrb[48].mxu0 }
 0x1c4   : >> { %1903 = vtanh.bf16 %v847_v58  ;;  %v748_v0 = vpop.f32.mrb[49].mxu0  ;;  %v971_v60 = vmul.bf16 %v939_v57, %v811_v22 }
 0x1c5   : >> { %v972_v62 = vmul.bf16 %v940_v59, %v812_v24  ;;  %1905 = vtanh.bf16 %v848_v61 }
 0x1c7   : >> { %v1900_v2 = vpop.eup %1899  ;;  %v752_v3 = vpop.f32.mrb[50].mxu0  ;;  %1023 = vmatprep.subr.bf16.mxu1 %v972_v62 }
 0x1c8   : >> { %v1902_v16 = vpop.eup %1901  ;;  %v909_v17 = vmul.bf16 1056980736, %v1900_v2  ;;  %v817_v4 = vpack.c.bf16 %v752_v3, %v746_v63  ;;  %v754_v1 = vpop.f32.mrb[51].mxu0  ;;  %1024 = vmatpush1.bf16.msra.mxu1 %v971_v60 }
 0x1c9   : >> { %v910_v19 = vmul.bf16 1056980736, %v1902_v16  ;;  %v818_v20 = vpack.c.bf16 %v754_v1, %v748_v0 }
 0x1ca   : >> { %v941_v21 = vadd.bf16 1056980736, %v909_v17  ;;  %v849_v18 = vmul.bf16 1056980736, %v817_v4 }
 0x1cb   : >> { %v942_v15 = vadd.bf16 1056980736, %v910_v19  ;;  %v850_v23 = vmul.bf16 1056980736, %v818_v20  ;;  %v758_v25 = vpop.f32.mrb[52].mxu0 }
 0x1cc   : >> { %1907 = vtanh.bf16 %v849_v18  ;;  %v760_v26 = vpop.f32.mrb[53].mxu0  ;;  %v973_v22 = vmul.bf16 %v941_v21, %v813_v36 }
 0x1cd   : >> { %v974_v24 = vmul.bf16 %v942_v15, %v814_v40  ;;  %1909 = vtanh.bf16 %v850_v23 }
 0x1cf   : >> { %v1904_v28 = vpop.eup %1903  ;;  %v764_v29 = vpop.f32.mrb[54].mxu0  ;;  %1025 = vmatprep.subr.bf16.mxu1 %v974_v24 }
 0x1d0   : >> { %v1906_v31 = vpop.eup %1905  ;;  %v911_v32 = vmul.bf16 1056980736, %v1904_v28  ;;  %v819_v30 = vpack.c.bf16 %v764_v29, %v758_v25  ;;  %v766_v27 = vpop.f32.mrb[55].mxu0  ;;  %1026 = vmatpush1.bf16.msra.mxu1 %v973_v22 }
 0x1d1   : >> { %v912_v34 = vmul.bf16 1056980736, %v1906_v31  ;;  %v820_v35 = vpack.c.bf16 %v766_v27, %v760_v26 }
 0x1d2   : >> { %v943_v37 = vadd.bf16 1056980736, %v911_v32  ;;  %v851_v38 = vmul.bf16 1056980736, %v819_v30 }
 0x1d3   : >> { %v944_v33 = vadd.bf16 1056980736, %v912_v34  ;;  %v852_v39 = vmul.bf16 1056980736, %v820_v35  ;;  %v770_v41 = vpop.f32.mrb[56].mxu0 }
 0x1d4   : >> { %1911 = vtanh.bf16 %v851_v38  ;;  %v772_v42 = vpop.f32.mrb[57].mxu0  ;;  %v975_v36 = vmul.bf16 %v943_v37, %v815_v52  ;;  %v1853_v37 = vld [vmem:[%s2285_s14] ss:$8 sps:$4 sm:$0xff]   ;;  %v1856_v38 = vld [vmem:[%s2285_s14 + $0x14] ss:$8 sps:$4 sm:$0xff]  }
 0x1d5   : >> { %v976_v40 = vmul.bf16 %v944_v33, %v816_v56  ;;  %1913 = vtanh.bf16 %v852_v39  ;;  %v1858_v33 = vld [vmem:[%s2285_s14 + $0x10] ss:$8 sps:$4 sm:$0xff]  }
 0x1d7   : >> { %v1908_v44 = vpop.eup %1907  ;;  %v776_v45 = vpop.f32.mrb[58].mxu0  ;;  %1027 = vmatprep.subr.bf16.mxu1 %v976_v40 }
 0x1d8   : >> { %v1910_v47 = vpop.eup %1909  ;;  %v913_v48 = vmul.bf16 1056980736, %v1908_v44  ;;  %v821_v46 = vpack.c.bf16 %v776_v45, %v770_v41  ;;  %v778_v43 = vpop.f32.mrb[59].mxu0  ;;  %1028 = vmatpush1.bf16.msra.mxu1 %v975_v36 }
 0x1d9   : >> { %v914_v50 = vmul.bf16 1056980736, %v1910_v47  ;;  %v822_v51 = vpack.c.bf16 %v778_v43, %v772_v42 }
 0x1da   : >> { %v945_v53 = vadd.bf16 1056980736, %v913_v48  ;;  %v853_v54 = vmul.bf16 1056980736, %v821_v46 }
 0x1db   : >> { %v946_v49 = vadd.bf16 1056980736, %v914_v50  ;;  %v854_v55 = vmul.bf16 1056980736, %v822_v51  ;;  %v782_v57 = vpop.f32.mrb[60].mxu0 }
 0x1dc   : >> { %1915 = vtanh.bf16 %v853_v54  ;;  %v784_v58 = vpop.f32.mrb[61].mxu0  ;;  %v977_v52 = vmul.bf16 %v945_v53, %v817_v4 }
 0x1dd   : >> { %v978_v56 = vmul.bf16 %v946_v49, %v818_v20  ;;  %1917 = vtanh.bf16 %v854_v55  ;;  %v1923_v49 = vld [vmem:[%s2417_s4] sm:$0xff] (%p379_p5)  }
 0x1de   : > { %1673 = vmatprep.subr.bf16.mxu0 (%p379_p5), %v1923_v49 }
 0x1df   : >> { %v1912_v59 = vpop.eup %1911  ;;  %v788_v61 = vpop.f32.mrb[62].mxu0  ;;  %1029 = vmatprep.subr.bf16.mxu1 %v978_v56  ;;  %1674 = vmatpush3.bf16.msra.mxu0 (%p379_p5), %v1923_v49  ;;  %v1932_v56 = vld [vmem:[%s2419_s6 + $0x8] sm:$0xff] (%p379_p5)  }
 0x1e0   : >> { %v1914_v63 = vpop.eup %1913  ;;  %v915_v0 = vmul.bf16 1056980736, %v1912_v59  ;;  %v823_v62 = vpack.c.bf16 %v788_v61, %v782_v57  ;;  %v790_v60 = vpop.f32.mrb[63].mxu0  ;;  %1030 = vmatpush1.bf16.msra.mxu1 %v977_v52  ;;  %v1924_v57 = vld [vmem:[%s2417_s4 + $0x8] sm:$0xff] (%p379_p5)   ;;  %v1933_v52 = vld [vmem:[%s2419_s6 + $0x10] sm:$0xff] (%p379_p5)   ;;  %v1934_v59 = vld [vmem:[%s2419_s6 + $0x18] sm:$0xff] (%p379_p5)  }
 0x1e1   : >> { %v916_v2 = vmul.bf16 1056980736, %v1914_v63  ;;  %v824_v3 = vpack.c.bf16 %v790_v60, %v784_v58  ;;  %1675 = vmatprep.subr.bf16.mxu0 (%p379_p5), %v1924_v57  ;;  %v1925_v58 = vld [vmem:[%s2417_s4 + $0x10] sm:$0xff] (%p379_p5)   ;;  %v1935_v61 = vld [vmem:[%s2419_s6 + $0x20] sm:$0xff] (%p379_p5)   ;;  %v1936_v63 = vld [vmem:[%s2419_s6 + $0x28] sm:$0xff] (%p379_p5)  }
 0x1e2   : >> { %v947_v16 = vadd.bf16 1056980736, %v915_v0  ;;  %v855_v17 = vmul.bf16 1056980736, %v823_v62  ;;  %v1937_v0 = vld [vmem:[%s2419_s6 + $0x30] sm:$0xff] (%p379_p5)  }
 0x1e3   : >> { %v948_v1 = vadd.bf16 1056980736, %v916_v2  ;;  %v856_v19 = vmul.bf16 1056980736, %v824_v3  ;;  %1676 = vmatpush3.bf16.msra.mxu0 (%p379_p5), %v1924_v57  ;;  %v1610_v60 = vld [vmem:[%s2418_s5] ss:$0 sm:$0xff] (%p379_p5) }
 0x1e4   : >> { %1919 = vtanh.bf16 %v855_v17  ;;  %v979_v20 = vmul.bf16 %v947_v16, %v819_v30  ;;  %1677 = vmatprep.subr.bf16.mxu0 (%p379_p5), %v1925_v58 }
 0x1e5   : >> { %v980_v21 = vmul.bf16 %v948_v1, %v820_v35  ;;  %1921 = vtanh.bf16 %v856_v19 }
 0x1e7   : >> { %v1916_v18 = vpop.eup %1915  ;;  %1031 = vmatprep.subr.bf16.mxu1 %v980_v21  ;;  %1678 = vmatpush3.bf16.msra.mxu0 (%p379_p5), %v1925_v58 }
 0x1e8   : >> { %v1918_v4 = vpop.eup %1917  ;;  %v917_v15 = vmul.bf16 1056980736, %v1916_v18  ;;  %1032 = vmatpush1.bf16.msra.mxu1 %v979_v20  ;;  %1679 = vmatprep.subr.bf16.mxu0 (%p379_p5), %v1926_v5 }
 0x1e9   : >> { %v918_v23 = vmul.bf16 1056980736, %v1918_v4 }
 0x1ea   : >> { %v949_v25 = vadd.bf16 1056980736, %v917_v15 }
 0x1eb   : >> { %v950_v26 = vadd.bf16 1056980736, %v918_v23  ;;  %1680 = vmatpush3.bf16.msra.mxu0 (%p379_p5), %v1926_v5 }
 0x1ec   : >> { %v981_v22 = vmul.bf16 %v949_v25, %v821_v46 }
 0x1ed   : >> { %v982_v24 = vmul.bf16 %v950_v26, %v822_v51 }
 0x1ef   : >> { %v1920_v28 = vpop.eup %1919  ;;  %1033 = vmatprep.subr.bf16.mxu1 %v982_v24 }
 0x1f0   : >> { %v1922_v29 = vpop.eup %1921  ;;  %v919_v31 = vmul.bf16 1056980736, %v1920_v28  ;;  %1034 = vmatpush1.bf16.msra.mxu1 %v981_v22 }
 0x1f1   : >> { %v920_v32 = vmul.bf16 1056980736, %v1922_v29 }
 0x1f2   : >> { %v951_v30 = vadd.bf16 1056980736, %v919_v31 }
 0x1f3   : >> { %v952_v27 = vadd.bf16 1056980736, %v920_v32 }
 0x1f4   : >> { %v983_v35 = vmul.bf16 %v951_v30, %v823_v62  ;;  %v2382_v62 = vld [vmem:[%s2419_s6 + $0x38] sm:$0xff] (%p379_p5)  }
 0x1f5   : >> { %v984_v34 = vmul.bf16 %v952_v27, %v824_v3 }
 0x1f7   : >> { %1035 = vmatprep.subr.bf16.mxu1 %v984_v34 }
 0x1f8   : >> { %1036 = vmatpush1.bf16.msra.mxu1 %v983_v35 }
 0x1f9   : > { %1693 = vmatprep.subr.bf16.mxu1 (%p379_p5), %v2343_v6 }
 0x1fb   : >> { %1038 = vmatmul.mubr.bf16.vlgmr.msra.gmra.mrb[0].mxu1 %v1853_v37 }
 0x1fc   : >> { %1047 = vmatprep.mubr.bf16.mxu1 %v1856_v38  ;;  %1694 = vmatpush3.bf16.msra.mxu1 (%p379_p5), %v2343_v6 }
 0x1fd   : > { %1695 = vmatprep.subr.bf16.mxu1 (%p379_p5), %v1932_v56 }
 0x200   : > { %1696 = vmatpush3.bf16.msra.mxu1 (%p379_p5), %v1932_v56 }
 0x201   : > { %1697 = vmatprep.subr.bf16.mxu1 (%p379_p5), %v1933_v52 }
 0x203   : >> { %1048 = vmatmul.mubr.bf16.gmra.mrb[4].mxu1 %v1858_v33 }
 0x204   : > { %1698 = vmatpush3.bf16.msra.mxu1 (%p379_p5), %v1933_v52 }
 0x205   : > { %1699 = vmatprep.subr.bf16.mxu1 (%p379_p5), %v1934_v59 }
 0x208   : > { %1700 = vmatpush3.bf16.msra.mxu1 (%p379_p5), %v1934_v59 }
 0x209   : > { %1701 = vmatprep.subr.bf16.mxu1 (%p379_p5), %v1935_v61 }
 0x20c   : > { %1702 = vmatpush3.bf16.msra.mxu1 (%p379_p5), %v1935_v61 }
 0x20d   : > { %1703 = vmatprep.subr.bf16.mxu1 (%p379_p5), %v1936_v63 }
 0x210   : > { %1704 = vmatpush3.bf16.msra.mxu1 (%p379_p5), %v1936_v63 }
 0x211   : > { %1705 = vmatprep.subr.bf16.mxu1 (%p379_p5), %v1937_v0 }
 0x214   : > { %1706 = vmatpush3.bf16.msra.mxu1 (%p379_p5), %v1937_v0 }
 0x215   : > { %1707 = vmatprep.subr.bf16.mxu1 (%p379_p5), %v2382_v62 }
 0x218   : > { %1708 = vmatpush3.bf16.msra.mxu1 (%p379_p5), %v2382_v62 }
 0x219   : > { %1733 = vmatprep.subr.bf16.mxu1 (%p379_p5), %v2343_v6 }
 0x2ce   : >> { %v1039_v39 = vpop.f32.mrb[0].mxu1 }
 0x2cf   : >> { %v1058_v41 = vadd.f32 %v2037_v8, %v1039_v39   ;;  %v1041_v42 = vpop.f32.mrb[1].mxu1 }
 0x2d0   : >> { %v1059_v40 = vadd.f32 %v2033_v14, %v1041_v42   ;;  %v1043_v36 = vpop.f32.mrb[2].mxu1 }
 0x2d1   : >> { %v1060_v44 = vadd.f32 %v2029_v10, %v1043_v36   ;;  %v1045_v45 = vpop.f32.mrb[3].mxu1 }
 0x2d2   : >> { %v1061_v47 = vadd.f32 %v2025_v13, %v1045_v45   ;;  %v2434_v14 = vmov %v1059_v40 }
 0x2d3   : >> { %v2433_v10 = vmov %v1060_v44  ;;  %v1066_v55 = vpack.c.bf16 (%p379_p5), %v1060_v44, %v1058_v41 }
 0x2d4   : >> { %v2432_v13 = vmov %v1061_v47  ;;  %v1929_v10 = vld [vmem:[%s2417_s4 + $0x30] sm:$0xff] (%p379_p5)  }
 0x2d5   : > { %1689 = vmatprep.mubr.bf16.mxu0 (%p379_p5), %v1066_v55  ;;  %v1067_v13 = vpack.c.bf16 (%p379_p5), %v1061_v47, %v1059_v40 }
 0x2d6   : >> { %v1049_v48 = vpop.f32.mrb[4].mxu1 }
 0x2d7   : >> { %v1062_v46 = vadd.f32 %v2021_v7, %v1049_v48   ;;  %v1051_v43 = vpop.f32.mrb[5].mxu1  ;;  %381 = sbr.rel (!%p379_p5) target bundleno = 141 (0x8d), region = 91 }
 0x2d8   : >> { %v2301_v12 = vadd.f32 %v2017_v12, %v1051_v43   ;;  %v1053_v51 = vpop.f32.mrb[6].mxu1 }
 0x2d9   : >> { %v1064_v53 = vadd.f32 %v2013_v9, %v1053_v51   ;;  %v1055_v8 = vpop.f32.mrb[7].mxu1  ;;  %v2431_v7 = vmov %v1062_v46 }
 0x2da   : >> { %v2426_v50 = vmov %v2301_v12  ;;  %v2305_v11 = vadd.f32 %v2009_v11, %v1055_v8   ;;  %v2435_v8 = vmov %v1058_v41  ;;  %v1927_v7 = vld [vmem:[%s2417_s4 + $0x20] sm:$0xff] (%p379_p5)  }
 0x2db   : >> { %v2429_v9 = vmov %v1064_v53  ;;  %v2430_v12 = vmov %v2426_v50  ;;  %1681 = vmatprep.subr.bf16.mxu0 (%p379_p5), %v1927_v7 }
 0x2dc   : >> { %v2427_v54 = vmov %v2305_v11  ;;  %v1928_v9 = vld [vmem:[%s2417_s4 + $0x28] sm:$0xff] (%p379_p5)   ;;  %1682 = vmatpush3.bf16.msra.mxu0 (%p379_p5), %v1927_v7  ;;  %v1068_v12 = vpack.c.bf16 (%p379_p5), %v1064_v53, %v1062_v46  ;;  %v1619_v53 = vld [vmem:[%s2420_s7] ss:$0 sm:$0xff] (%p379_p5) }
 0x2dd   : >> { %v2428_v11 = vmov %v2427_v54  ;;  %1683 = vmatprep.subr.bf16.mxu0 (%p379_p5), %v1928_v9  ;;  %v1069_v14 = vpack.c.bf16 (%p379_p5), %v2427_v54, %v2426_v50 }
 0x2de   : > { %v1930_v11 = vld [vmem:[%s2417_s4 + $0x38] sm:$0xff]  }
 0x2e0   : > { %1684 = vmatpush3.bf16.msra.mxu0 %v1928_v9 }
 0x2e1   : > { %1685 = vmatprep.subr.bf16.mxu0 %v1929_v10 }
 0x2e4   : > { %1686 = vmatpush3.bf16.msra.mxu0 %v1929_v10 }
 0x2e5   : > { %1687 = vmatprep.subr.bf16.mxu0 %v1930_v11 }
 0x2e8   : > { %1688 = vmatpush3.bf16.msra.mxu0 %v1930_v11 }
 0x2e9   : > { %1713 = vmatprep.subr.bf16.mxu0 %v1923_v49 }
 0x2eb   : > { %1690 = vmatmul.mubr.bf16.vlgmr.msra.gmra.mrb[0].mxu0 %v1068_v12 }
 0x2ec   : > { %1714 = vmatpush3.bf16.msra.mxu0 %v1923_v49  ;;  %1729 = vmatprep.mubr.bf16.mxu0 %v1067_v13 }
 0x2ed   : > { %1715 = vmatprep.subr.bf16.mxu0 %v1924_v57 }
 0x2f0   : > { %1716 = vmatpush3.bf16.msra.mxu0 %v1924_v57 }
 0x2f1   : > { %1717 = vmatprep.subr.bf16.mxu0 %v1925_v58 }
 0x2f4   : > { %1718 = vmatpush3.bf16.msra.mxu0 %v1925_v58 }
 0x2f5   : > { %1719 = vmatprep.subr.bf16.mxu0 %v1926_v5 }
 0x2f8   : > { %1720 = vmatpush3.bf16.msra.mxu0 %v1926_v5 }
 0x2f9   : > { %1721 = vmatprep.subr.bf16.mxu0 %v1927_v7 }
 0x2fc   : > { %1722 = vmatpush3.bf16.msra.mxu0 %v1927_v7 }
 0x2fd   : > { %1723 = vmatprep.subr.bf16.mxu0 %v1928_v9 }
 0x300   : > { %1724 = vmatpush3.bf16.msra.mxu0 %v1928_v9 }
 0x301   : > { %1725 = vmatprep.subr.bf16.mxu0 %v1929_v10 }
 0x304   : > { %1726 = vmatpush3.bf16.msra.mxu0 %v1929_v10 }
 0x305   : > { %1727 = vmatprep.subr.bf16.mxu0 %v1930_v11 }
 0x308   : > { %1728 = vmatpush3.bf16.msra.mxu0 %v1930_v11 }
 0x30b   : > { %1730 = vmatmul.mubr.bf16.vlgmr.msra.gmra.mrb[4].mxu0 %v1069_v14 }
 0x3be   : > { %v1691_v2 = vpop.f32.mrb[0].mxu0 }
 0x3bf   : > { %v1201_v3 = vadd.f32 %v1691_v2, %v1610_v60  ;;  %v1192_v16 = vpop.f32.mrb[1].mxu0 }
 0x3c0   : > { %v1692_v17 = vpop.f32.mrb[2].mxu0  ;;  %v1193_v21 = vadd.f32 %v1610_v60, %v1192_v16 }
 0x3c1   : > { %v1204_v1 = vadd.f32 %v1692_v17, %v1610_v60  ;;  %v1195_v19 = vpop.f32.mrb[3].mxu0 }
 0x3c2   : > { %v1196_v20 = vadd.f32 %v1610_v60, %v1195_v19 }
 0x3c3   : > { %v1208_v18 = vpack.c.bf16 %v1204_v1, %v1201_v3 }
 0x3c4   : > { %v1207_v4 = vpack.c.bf16 %v1196_v20, %v1193_v21 }
 0x3c5   : > { %v1210_v15 = vmul.bf16 1056980736, %v1208_v18 }
 0x3c6   : > { %v1209_v23 = vmul.bf16 1056980736, %v1207_v4 }
 0x3c7   : > { %1939 = vtanh.bf16 %v1210_v15 }
 0x3c8   : > { %1941 = vtanh.bf16 %v1209_v23 }
 0x3d2   : > { %v1940_v25 = vpop.eup %1939 }
 0x3d3   : > { %v1942_v26 = vpop.eup %1941  ;;  %v1214_v24 = vmul.bf16 1056980736, %v1940_v25 }
 0x3d4   : > { %v1213_v22 = vmul.bf16 1056980736, %v1942_v26 }
 0x3d5   : > { %v1216_v28 = vadd.bf16 1056980736, %v1214_v24 }
 0x3d6   : > { %v1215_v29 = vadd.bf16 1056980736, %v1213_v22 }
 0x3d7   : > { %v1218_v32 = vmul.bf16 %v1216_v28, %v1208_v18 }
 0x3d8   : > { %v1217_v31 = vmul.bf16 %v1215_v29, %v1207_v4 }
 0x3da   : > { %1709 = vmatprep.mubr.bf16.mxu1 %v1217_v31 }
 0x3db   : > { %1710 = vmatmul.mubr.bf16.vlgmr.msra.gmra.mrb[0].mxu1 %v1218_v32 }
 0x3dc   : > { %1734 = vmatpush3.bf16.msra.mxu1 %v2343_v6 }
 0x3dd   : > { %1735 = vmatprep.subr.bf16.mxu1 %v1932_v56 }
 0x3de   : > { %v1731_v30 = vpop.f32.mrb[4].mxu0 }
 0x3df   : > { %v1360_v27 = vpop.f32.mrb[5].mxu0  ;;  %v1369_v35 = vadd.f32 %v1731_v30, %v1610_v60 }
 0x3e0   : > { %v1732_v34 = vpop.f32.mrb[6].mxu0  ;;  %1736 = vmatpush3.bf16.msra.mxu1 %v1932_v56  ;;  %v1361_v33 = vadd.f32 %v1610_v60, %v1360_v27 }
 0x3e1   : > { %v1372_v37 = vadd.f32 %v1732_v34, %v1610_v60  ;;  %v1363_v38 = vpop.f32.mrb[7].mxu0  ;;  %1737 = vmatprep.subr.bf16.mxu1 %v1933_v52 }
 0x3e2   : > { %v1364_v39 = vadd.f32 %v1610_v60, %v1363_v38 }
 0x3e3   : > { %v1376_v41 = vpack.c.bf16 %v1372_v37, %v1369_v35 }
 0x3e4   : > { %v1375_v42 = vpack.c.bf16 %v1364_v39, %v1361_v33  ;;  %1738 = vmatpush3.bf16.msra.mxu1 %v1933_v52 }
 0x3e5   : > { %v1378_v40 = vmul.bf16 1056980736, %v1376_v41  ;;  %1739 = vmatprep.subr.bf16.mxu1 %v1934_v59 }
 0x3e6   : > { %v1377_v36 = vmul.bf16 1056980736, %v1375_v42 }
 0x3e7   : > { %1943 = vtanh.bf16 %v1378_v40 }
 0x3e8   : > { %1945 = vtanh.bf16 %v1377_v36  ;;  %1740 = vmatpush3.bf16.msra.mxu1 %v1934_v59 }
 0x3e9   : > { %1741 = vmatprep.subr.bf16.mxu1 %v1935_v61 }
 0x3ec   : > { %1742 = vmatpush3.bf16.msra.mxu1 %v1935_v61 }
 0x3ed   : > { %1743 = vmatprep.subr.bf16.mxu1 %v1936_v63 }
 0x3f0   : > { %1744 = vmatpush3.bf16.msra.mxu1 %v1936_v63 }
 0x3f1   : > { %1745 = vmatprep.subr.bf16.mxu1 %v1937_v0 }
 0x3f2   : > { %v1944_v44 = vpop.eup %1943 }
 0x3f3   : > { %v1946_v45 = vpop.eup %1945  ;;  %v1382_v47 = vmul.bf16 1056980736, %v1944_v44 }
 0x3f4   : > { %1746 = vmatpush3.bf16.msra.mxu1 %v1937_v0  ;;  %v1381_v48 = vmul.bf16 1056980736, %v1946_v45 }
 0x3f5   : > { %v1384_v46 = vadd.bf16 1056980736, %v1382_v47  ;;  %1747 = vmatprep.subr.bf16.mxu1 %v2382_v62 }
 0x3f6   : > { %v1383_v43 = vadd.bf16 1056980736, %v1381_v48 }
 0x3f7   : > { %v1386_v51 = vmul.bf16 %v1384_v46, %v1376_v41 }
 0x3f8   : > { %1748 = vmatpush3.bf16.msra.mxu1 %v2382_v62  ;;  %v1385_v50 = vmul.bf16 %v1383_v43, %v1375_v42 }
 0x3fa   : > { %1749 = vmatprep.mubr.bf16.mxu1 %v1385_v50 }
 0x3fb   : > { %1750 = vmatmul.mubr.bf16.vlgmr.msra.gmra.mrb[4].mxu1 %v1386_v51 }
 0x4ae   : > { %v1711_v8 = vpop.f32.mrb[0].mxu1 }
 0x4af   : > { %v1316_v54 = vadd.f32 %v1711_v8, %v1619_v53  ;;  %v1307_v49 = vpop.f32.mrb[1].mxu1 }
 0x4b0   : > { %v1308_v55 = vadd.f32 %v1619_v53, %v1307_v49  ;;  %v1712_v57 = vpop.f32.mrb[2].mxu1 }
 0x4b1   : > { %1324 = vst [vmem:[%s2126_s24 + $0x20] sm:$0xff] %v1316_v54  ;;  %v1319_v58 = vadd.f32 %v1712_v57, %v1619_v53  ;;  %v1310_v5 = vpop.f32.mrb[3].mxu1 }
 0x4b2   : > { %1322 = vst [vmem:[%s2126_s24] sm:$0xff] %v1308_v55  ;;  %v1311_v6 = vadd.f32 %v1619_v53, %v1310_v5 }
 0x4b3   : > { %1325 = vst [vmem:[%s2126_s24 + $0x30] sm:$0xff] %v1319_v58 }
 0x4b4   : > { %1323 = vst [vmem:[%s2126_s24 + $0x10] sm:$0xff] %v1311_v6 }
 0x4ce   : > { %v1751_v7 = vpop.f32.mrb[4].mxu1 }
 0x4cf   : > { %v1430_v9 = vadd.f32 %v1751_v7, %v1619_v53  ;;  %v1421_v10 = vpop.f32.mrb[5].mxu1 }
 0x4d0   : > { %v1422_v11 = vadd.f32 %v1619_v53, %v1421_v10  ;;  %v1752_v12 = vpop.f32.mrb[6].mxu1 }
 0x4d1   : > { %1438 = vst [vmem:[%s2126_s24 + $0x28] sm:$0xff] %v1430_v9  ;;  %v1433_v13 = vadd.f32 %v1752_v12, %v1619_v53  ;;  %v1424_v14 = vpop.f32.mrb[7].mxu1 }
 0x4d2   : > { %1436 = vst [vmem:[%s2126_s24 + $0x8] sm:$0xff] %v1422_v11  ;;  %v1425_v56 = vadd.f32 %v1619_v53, %v1424_v14 }
 0x4d3   : > { %1439 = vst [vmem:[%s2126_s24 + $0x38] sm:$0xff] %v1433_v13 }
 0x4d4   : > { %1437 = vst [vmem:[%s2126_s24 + $0x18] sm:$0xff] %v1425_v56 }
 0x4d5 PF: > { %s18_s29 = sadd.s32 1, %s2005_s29   ;;  %s2436_s27 = smov %s2001_s28 }
 0x4d6   : > { %p15_p6 = scmp.ge.s32.totalorder %s18_s29, 4   ;;  %s2437_s28 = smov %s2439_s30 }
 0x4d8   :  { %17 = sbr.rel (!%p15_p6) target bundleno = 2 (0x2), region = 102 }

</bundles_post_ra>
